<compile_context>
chip_gen: v5e
topology: v5e:2x2
jax: 0.10.0
libtpu: 0.0.40
codegen_flags: <defaults>
</compile_context>

<pallas_src>
import math
import functools

import jax
import jax.numpy as jnp
from jax.experimental import pallas as pl
from jax.experimental.pallas import tpu as pltpu


# ---------------------------------------------------------------------------
# Fused kernel: one batch element per grid step.
# ---------------------------------------------------------------------------
def mvca_kernel(q_ref, k_ref, v_ref, wq_ref, wk_ref, wv_ref, wo_ref, vec_ref,
                out_ref, *, num_heads, head_dim, ln_eps):
    """MultiViewCrossAttentionWithEdges forward for one batch element.

    q_ref:   [Lq, E]   bf16   (E = num_heads * head_dim)
    k_ref:   [Lk, Ck]  bf16
    v_ref:   [Lk, Ck]  bf16
    wq_ref:  [E, E]    bf16   (pre-scaled by 1/sqrt(head_dim))
    wk_ref:  [Ck, E]   bf16
    wv_ref:  [Ck, E]   bf16
    wo_ref:  [E, E]    bf16   (LayerNorm gamma pre-folded)
    vec_ref: [4, E]    f32    rows = (bq*scale, bk, bv, bo + ln_beta @ wo)
    out_ref: [Lq, E]   f32
    """
    H, hd = num_heads, head_dim

    bq = vec_ref[0:1, :]
    bk = vec_ref[1:2, :]
    bv = vec_ref[2:3, :]
    bo = vec_ref[3:4, :]

    # --- Projections: one MXU matmul each (bf16 in, f32 accumulate). -------
    q = jnp.dot(q_ref[...], wq_ref[...],
                preferred_element_type=jnp.float32) + bq            # [Lq, E]
    k = jnp.dot(k_ref[...], wk_ref[...],
                preferred_element_type=jnp.float32) + bk            # [Lk, E]
    v = jnp.dot(v_ref[...], wv_ref[...],
                preferred_element_type=jnp.float32) + bv            # [Lk, E]

    qb = q.astype(jnp.bfloat16)
    kb = k.astype(jnp.bfloat16)
    vb = v.astype(jnp.bfloat16)

    # --- Split heads -> [H, L, hd]: lane slices stacked on a new leading
    # (batch) dim; the lane dim itself is never reshaped. --------------------
    def split_heads(x):
        return jnp.concatenate(
            [x[None, :, h * hd:(h + 1) * hd] for h in range(H)], axis=0)

    qh = split_heads(qb)                                            # [H,Lq,hd]
    kh = split_heads(kb)                                            # [H,Lk,hd]
    vh = split_heads(vb)                                            # [H,Lk,hd]

    # --- All heads in one batched contraction (scale folded into wq/bq). ---
    s = jnp.einsum('hqd,hkd->hqk', qh, kh,
                   preferred_element_type=jnp.float32)              # [H,Lq,Lk]

    # Softmax over the key axis.
    s = s - jnp.max(s, axis=-1, keepdims=True)
    p = jnp.exp(s)
    p = p * pl.reciprocal(jnp.sum(p, axis=-1, keepdims=True), approx=True)
    # TODO(synk): nn.Dropout(p=0.1) on the attention weights is identity here
    # (eval-mode semantics); training-mode RNG dropout is not implemented.

    ctx_h = jnp.einsum('hqk,hkd->hqd', p.astype(jnp.bfloat16), vh,
                       preferred_element_type=jnp.float32)          # [H,Lq,hd]

    # --- Merge heads back to [Lq, E] in vregs (no scratch round-trip). -----
    ctx = jnp.concatenate([ctx_h[h] for h in range(H)], axis=-1)    # [Lq, E]

    # --- LayerNorm (gamma/beta folded into wo/bo in the wrapper). ----------
    mu = jnp.mean(ctx, axis=-1, keepdims=True)
    var = jnp.mean((ctx - mu) ** 2, axis=-1, keepdims=True)
    ctxn = (ctx - mu) * jax.lax.rsqrt(var + ln_eps)

    # --- Output projection + folded bias (single lane-dense tile store). ---
    out_ref[...] = (jnp.dot(ctxn.astype(jnp.bfloat16), wo_ref[...],
                            preferred_element_type=jnp.float32) + bo)


def multi_view_cross_attention(Q, K, V, params, *, num_heads=4, ln_eps=1e-5):
    B, Lq, E = Q.shape
    _, Lk, Ck = K.shape
    assert E % num_heads == 0
    head_dim = E // num_heads
    scale = 1.0 / math.sqrt(head_dim)

    # Trace-time algebraic folds (f32): scale into wq/bq, LN affine into
    # wo/bo.  NOTE: bo' uses the *un-scaled* wo so the fold is exact.
    wq_f = params["wq"] * scale
    bq_f = params["bq"] * scale
    wo_f = params["ln_g"][:, None] * params["wo"]
    bo_f = params["bo"] + params["ln_b"] @ params["wo"]

    # Pack all E-wide bias vectors into one f32 array -> one DMA.
    vecs = jnp.stack([bq_f, params["bk"], params["bv"], bo_f],
                     axis=0).astype(jnp.float32)

    to_bf16 = lambda x: x.astype(jnp.bfloat16)

    kernel = functools.partial(mvca_kernel, num_heads=num_heads,
                               head_dim=head_dim, ln_eps=ln_eps)

    grid_spec = pltpu.PrefetchScalarGridSpec(
        num_scalar_prefetch=0,
        grid=(B,),
        in_specs=[
            pl.BlockSpec((None, Lq, E), lambda b: (b, 0, 0)),     # Q
            pl.BlockSpec((None, Lk, Ck), lambda b: (b, 0, 0)),    # K
            pl.BlockSpec((None, Lk, Ck), lambda b: (b, 0, 0)),    # V
            pl.BlockSpec((E, E), lambda b: (0, 0)),               # wq' (resident)
            pl.BlockSpec((Ck, E), lambda b: (0, 0)),              # wk
            pl.BlockSpec((Ck, E), lambda b: (0, 0)),              # wv
            pl.BlockSpec((E, E), lambda b: (0, 0)),               # wo'
            pl.BlockSpec((4, E), lambda b: (0, 0)),               # packed biases
        ],
        out_specs=pl.BlockSpec((None, Lq, E), lambda b: (b, 0, 0)),
    )

    return pl.pallas_call(
        kernel,
        out_shape=jax.ShapeDtypeStruct((B, Lq, E), jnp.float32),
        grid_spec=grid_spec,
        compiler_params=pltpu.CompilerParams(
            dimension_semantics=("parallel",),   # batch axis -> both TCs on v7x
            vmem_limit_bytes=32 * 1024 * 1024,
        ),
    )(to_bf16(Q), to_bf16(K), to_bf16(V),
      to_bf16(wq_f), to_bf16(params["wk"]), to_bf16(params["wv"]),
      to_bf16(wo_f), vecs)


# ---------------------------------------------------------------------------
# Parameter init (deterministic, synthetic) and pure-JAX reference
# ---------------------------------------------------------------------------
def init_params(key, embed_dim, cls_dim):
    ks = jax.random.split(key, 10)
    s = 0.05
    return dict(
        wq=jax.random.normal(ks[0], (embed_dim, embed_dim), jnp.float32) * s,
        bq=jax.random.normal(ks[1], (embed_dim,), jnp.float32) * s,
        wk=jax.random.normal(ks[2], (cls_dim, embed_dim), jnp.float32) * s,
        bk=jax.random.normal(ks[3], (embed_dim,), jnp.float32) * s,
        wv=jax.random.normal(ks[4], (cls_dim, embed_dim), jnp.float32) * s,
        bv=jax.random.normal(ks[5], (embed_dim,), jnp.float32) * s,
        wo=jax.random.normal(ks[6], (embed_dim, embed_dim), jnp.float32) * s,
        bo=jax.random.normal(ks[7], (embed_dim,), jnp.float32) * s,
        # Non-trivial LayerNorm affine so the wo/bo fold is actually exercised.
        ln_g=1.0 + 0.1 * jax.random.normal(ks[8], (embed_dim,), jnp.float32),
        ln_b=0.1 * jax.random.normal(ks[9], (embed_dim,), jnp.float32),
    )


def mvca_reference(Q, K, V, params, *, num_heads=4, ln_eps=1e-5):
    B, Lq, E = Q.shape
    hd = E // num_heads
    q = Q @ params["wq"] + params["bq"]
    k = K @ params["wk"] + params["bk"]
    v = V @ params["wv"] + params["bv"]

    def heads(x):
        b, l, _ = x.shape
        return x.reshape(b, l, num_heads, hd).transpose(0, 2, 1, 3)

    qh, kh, vh = heads(q), heads(k), heads(v)
    s = jnp.einsum("bhqd,bhkd->bhqk", qh, kh) / math.sqrt(hd)
    w = jax.nn.softmax(s, axis=-1)
    ctx = jnp.einsum("bhqk,bhkd->bhqd", w, vh)
    ctx = ctx.transpose(0, 2, 1, 3).reshape(B, Lq, E)
    mu = ctx.mean(-1, keepdims=True)
    var = ((ctx - mu) ** 2).mean(-1, keepdims=True)
    ctx = (ctx - mu) / jnp.sqrt(var + ln_eps) * params["ln_g"] + params["ln_b"]
    return ctx @ params["wo"] + params["bo"]


if __name__ == "__main__":
    key = jax.random.PRNGKey(0)
    B, Lq, Lk = 2, 8, 8
    embed_dim, cls_dim, num_heads = 32, 64, 4

    kq, kk, kv, kp = jax.random.split(key, 4)
    Q = jax.random.normal(kq, (B, Lq, embed_dim), jnp.float32)
    K = jax.random.normal(kk, (B, Lk, cls_dim), jnp.float32)
    V = jax.random.normal(kv, (B, Lk, cls_dim), jnp.float32)
    params = init_params(kp, embed_dim, cls_dim)

    out = multi_view_cross_attention(Q, K, V, params, num_heads=num_heads)
    out = jax.block_until_ready(out)

    assert out.shape == (B, Lq, embed_dim)
    assert bool(jnp.all(jnp.isfinite(out)))

    ref = mvca_reference(Q, K, V, params, num_heads=num_heads)
    max_err = float(jnp.max(jnp.abs(out - ref)))
    assert max_err < 5e-2, f"kernel/reference mismatch: {max_err}"
    print("KERNEL_OK")
</pallas_src>

<mosaic_0001>
module attributes {stable_mosaic.version = 11 : i64} {
  func.func @mvca_kernel(%arg0: i32, %arg1: memref<1x8x32xbf16, #tpu.memory_space<vmem>>, %arg2: memref<1x8x64xbf16, #tpu.memory_space<vmem>>, %arg3: memref<1x8x64xbf16, #tpu.memory_space<vmem>>, %arg4: memref<32x32xbf16, #tpu.memory_space<vmem>>, %arg5: memref<64x32xbf16, #tpu.memory_space<vmem>>, %arg6: memref<64x32xbf16, #tpu.memory_space<vmem>>, %arg7: memref<32x32xbf16, #tpu.memory_space<vmem>>, %arg8: memref<4x32xf32, #tpu.memory_space<vmem>>, %arg9: memref<1x8x32xf32, #tpu.memory_space<vmem>>) attributes {dimension_semantics = [#tpu.dimension_semantics<parallel>], iteration_bounds = array<i64: 2>, scalar_prefetch = 0 : i64, scratch_operands = 0 : i64, tpu.core_type = #tpu.core_type<tc>, window_params = [{transform_indices = @transform_0, window_bounds = array<i64: 1, 8, 32>}, {transform_indices = @transform_1, window_bounds = array<i64: 1, 8, 64>}, {transform_indices = @transform_2, window_bounds = array<i64: 1, 8, 64>}, {pipeline_mode = #tpu.pipeline_mode<synchronous>, transform_indices = @transform_3, window_bounds = array<i64: 32, 32>}, {pipeline_mode = #tpu.pipeline_mode<synchronous>, transform_indices = @transform_4, window_bounds = array<i64: 64, 32>}, {pipeline_mode = #tpu.pipeline_mode<synchronous>, transform_indices = @transform_5, window_bounds = array<i64: 64, 32>}, {pipeline_mode = #tpu.pipeline_mode<synchronous>, transform_indices = @transform_6, window_bounds = array<i64: 32, 32>}, {pipeline_mode = #tpu.pipeline_mode<synchronous>, transform_indices = @transform_7, window_bounds = array<i64: 4, 32>}, {transform_indices = @transform_8, window_bounds = array<i64: 1, 8, 32>}]} {
    %c0 = arith.constant 0 : index
    %c0_0 = arith.constant 0 : index
    %0 = vector.load %arg8[%c0, %c0_0] : memref<4x32xf32, #tpu.memory_space<vmem>>, vector<1x32xf32>
    %c1 = arith.constant 1 : index
    %c0_1 = arith.constant 0 : index
    %1 = vector.load %arg8[%c1, %c0_1] : memref<4x32xf32, #tpu.memory_space<vmem>>, vector<1x32xf32>
    %c2 = arith.constant 2 : index
    %c0_2 = arith.constant 0 : index
    %2 = vector.load %arg8[%c2, %c0_2] : memref<4x32xf32, #tpu.memory_space<vmem>>, vector<1x32xf32>
    %c3 = arith.constant 3 : index
    %c0_3 = arith.constant 0 : index
    %3 = vector.load %arg8[%c3, %c0_3] : memref<4x32xf32, #tpu.memory_space<vmem>>, vector<1x32xf32>
    %c0_4 = arith.constant 0 : index
    %c0_5 = arith.constant 0 : index
    %c0_6 = arith.constant 0 : index
    %4 = vector.load %arg1[%c0_4, %c0_5, %c0_6] : memref<1x8x32xbf16, #tpu.memory_space<vmem>>, vector<1x8x32xbf16>
    %5 = vector.shape_cast %4 : vector<1x8x32xbf16> to vector<8x32xbf16>
    %c0_7 = arith.constant 0 : index
    %c0_8 = arith.constant 0 : index
    %6 = vector.load %arg4[%c0_7, %c0_8] : memref<32x32xbf16, #tpu.memory_space<vmem>>, vector<32x32xbf16>
    %cst = arith.constant dense<0.000000e+00> : vector<8x32xf32>
    %7 = tpu.matmul %5, %6, %cst {dimension_numbers = #tpu.dot_dimension_numbers<[1], [0], [0], [1], [0, 0, 1, 1], [], []>} : vector<8x32xbf16>, vector<32x32xbf16>, vector<8x32xf32> -> vector<8x32xf32>
    %8 = vector.broadcast %0 : vector<1x32xf32> to vector<8x32xf32>
    %9 = arith.addf %7, %8 : vector<8x32xf32>
    %c0_9 = arith.constant 0 : index
    %c0_10 = arith.constant 0 : index
    %c0_11 = arith.constant 0 : index
    %10 = vector.load %arg2[%c0_9, %c0_10, %c0_11] : memref<1x8x64xbf16, #tpu.memory_space<vmem>>, vector<1x8x64xbf16>
    %11 = vector.shape_cast %10 : vector<1x8x64xbf16> to vector<8x64xbf16>
    %c0_12 = arith.constant 0 : index
    %c0_13 = arith.constant 0 : index
    %12 = vector.load %arg5[%c0_12, %c0_13] : memref<64x32xbf16, #tpu.memory_space<vmem>>, vector<64x32xbf16>
    %cst_14 = arith.constant dense<0.000000e+00> : vector<8x32xf32>
    %13 = tpu.matmul %11, %12, %cst_14 {dimension_numbers = #tpu.dot_dimension_numbers<[1], [0], [0], [1], [0, 0, 1, 1], [], []>} : vector<8x64xbf16>, vector<64x32xbf16>, vector<8x32xf32> -> vector<8x32xf32>
    %14 = vector.broadcast %1 : vector<1x32xf32> to vector<8x32xf32>
    %15 = arith.addf %13, %14 : vector<8x32xf32>
    %c0_15 = arith.constant 0 : index
    %c0_16 = arith.constant 0 : index
    %c0_17 = arith.constant 0 : index
    %16 = vector.load %arg3[%c0_15, %c0_16, %c0_17] : memref<1x8x64xbf16, #tpu.memory_space<vmem>>, vector<1x8x64xbf16>
    %17 = vector.shape_cast %16 : vector<1x8x64xbf16> to vector<8x64xbf16>
    %c0_18 = arith.constant 0 : index
    %c0_19 = arith.constant 0 : index
    %18 = vector.load %arg6[%c0_18, %c0_19] : memref<64x32xbf16, #tpu.memory_space<vmem>>, vector<64x32xbf16>
    %cst_20 = arith.constant dense<0.000000e+00> : vector<8x32xf32>
    %19 = tpu.matmul %17, %18, %cst_20 {dimension_numbers = #tpu.dot_dimension_numbers<[1], [0], [0], [1], [0, 0, 1, 1], [], []>} : vector<8x64xbf16>, vector<64x32xbf16>, vector<8x32xf32> -> vector<8x32xf32>
    %20 = vector.broadcast %2 : vector<1x32xf32> to vector<8x32xf32>
    %21 = arith.addf %19, %20 : vector<8x32xf32>
    %22 = arith.truncf %9 : vector<8x32xf32> to vector<8x32xbf16>
    %23 = arith.truncf %15 : vector<8x32xf32> to vector<8x32xbf16>
    %24 = arith.truncf %21 : vector<8x32xf32> to vector<8x32xbf16>
    %25 = vector.extract_strided_slice %22 {offsets = [0, 0], sizes = [8, 8], strides = [1, 1]} : vector<8x32xbf16> to vector<8x8xbf16>
    %26 = vector.shape_cast %25 : vector<8x8xbf16> to vector<1x8x8xbf16>
    %27 = vector.extract_strided_slice %22 {offsets = [0, 8], sizes = [8, 8], strides = [1, 1]} : vector<8x32xbf16> to vector<8x8xbf16>
    %28 = vector.shape_cast %27 : vector<8x8xbf16> to vector<1x8x8xbf16>
    %29 = vector.extract_strided_slice %22 {offsets = [0, 16], sizes = [8, 8], strides = [1, 1]} : vector<8x32xbf16> to vector<8x8xbf16>
    %30 = vector.shape_cast %29 : vector<8x8xbf16> to vector<1x8x8xbf16>
    %31 = vector.extract_strided_slice %22 {offsets = [0, 24], sizes = [8, 8], strides = [1, 1]} : vector<8x32xbf16> to vector<8x8xbf16>
    %32 = vector.shape_cast %31 : vector<8x8xbf16> to vector<1x8x8xbf16>
    %33 = tpu.concatenate %26, %28, %30, %32 in 0 : vector<1x8x8xbf16>, vector<1x8x8xbf16>, vector<1x8x8xbf16>, vector<1x8x8xbf16> -> vector<4x8x8xbf16>
    %34 = vector.extract_strided_slice %23 {offsets = [0, 0], sizes = [8, 8], strides = [1, 1]} : vector<8x32xbf16> to vector<8x8xbf16>
    %35 = vector.shape_cast %34 : vector<8x8xbf16> to vector<1x8x8xbf16>
    %36 = vector.extract_strided_slice %23 {offsets = [0, 8], sizes = [8, 8], strides = [1, 1]} : vector<8x32xbf16> to vector<8x8xbf16>
    %37 = vector.shape_cast %36 : vector<8x8xbf16> to vector<1x8x8xbf16>
    %38 = vector.extract_strided_slice %23 {offsets = [0, 16], sizes = [8, 8], strides = [1, 1]} : vector<8x32xbf16> to vector<8x8xbf16>
    %39 = vector.shape_cast %38 : vector<8x8xbf16> to vector<1x8x8xbf16>
    %40 = vector.extract_strided_slice %23 {offsets = [0, 24], sizes = [8, 8], strides = [1, 1]} : vector<8x32xbf16> to vector<8x8xbf16>
    %41 = vector.shape_cast %40 : vector<8x8xbf16> to vector<1x8x8xbf16>
    %42 = tpu.concatenate %35, %37, %39, %41 in 0 : vector<1x8x8xbf16>, vector<1x8x8xbf16>, vector<1x8x8xbf16>, vector<1x8x8xbf16> -> vector<4x8x8xbf16>
    %43 = vector.extract_strided_slice %24 {offsets = [0, 0], sizes = [8, 8], strides = [1, 1]} : vector<8x32xbf16> to vector<8x8xbf16>
    %44 = vector.shape_cast %43 : vector<8x8xbf16> to vector<1x8x8xbf16>
    %45 = vector.extract_strided_slice %24 {offsets = [0, 8], sizes = [8, 8], strides = [1, 1]} : vector<8x32xbf16> to vector<8x8xbf16>
    %46 = vector.shape_cast %45 : vector<8x8xbf16> to vector<1x8x8xbf16>
    %47 = vector.extract_strided_slice %24 {offsets = [0, 16], sizes = [8, 8], strides = [1, 1]} : vector<8x32xbf16> to vector<8x8xbf16>
    %48 = vector.shape_cast %47 : vector<8x8xbf16> to vector<1x8x8xbf16>
    %49 = vector.extract_strided_slice %24 {offsets = [0, 24], sizes = [8, 8], strides = [1, 1]} : vector<8x32xbf16> to vector<8x8xbf16>
    %50 = vector.shape_cast %49 : vector<8x8xbf16> to vector<1x8x8xbf16>
    %51 = tpu.concatenate %44, %46, %48, %50 in 0 : vector<1x8x8xbf16>, vector<1x8x8xbf16>, vector<1x8x8xbf16>, vector<1x8x8xbf16> -> vector<4x8x8xbf16>
    "tpu.trace_start"() <{level = 10 : i32, message = "hqd,hkd->hqk"}> : () -> ()
    %cst_21 = arith.constant dense<0.000000e+00> : vector<4x8x8xf32>
    %52 = tpu.matmul %33, %42, %cst_21 {dimension_numbers = #tpu.dot_dimension_numbers<[2], [2], [1], [1], [0, 0, 0, 1, 1, 1], [0], [0]>} : vector<4x8x8xbf16>, vector<4x8x8xbf16>, vector<4x8x8xf32> -> vector<4x8x8xf32>
    "tpu.trace_stop"() : () -> ()
    %cst_22 = arith.constant dense<0xFF800000> : vector<4x8xf32>
    %53 = vector.multi_reduction <maximumf>, %52, %cst_22 [2] : vector<4x8x8xf32> to vector<4x8xf32>
    %54 = vector.shape_cast %53 : vector<4x8xf32> to vector<4x8x1xf32>
    %55 = vector.broadcast %54 : vector<4x8x1xf32> to vector<4x8x8xf32>
    %56 = arith.subf %52, %55 : vector<4x8x8xf32>
    %57 = math.exp %56 : vector<4x8x8xf32>
    %cst_23 = arith.constant dense<0.000000e+00> : vector<4x8xf32>
    %58 = vector.multi_reduction <add>, %57, %cst_23 [2] : vector<4x8x8xf32> to vector<4x8xf32>
    %59 = vector.shape_cast %58 : vector<4x8xf32> to vector<4x8x1xf32>
    %60 = tpu.reciprocal %59 {approx = true} : vector<4x8x1xf32> -> vector<4x8x1xf32>
    %61 = vector.broadcast %60 : vector<4x8x1xf32> to vector<4x8x8xf32>
    %62 = arith.mulf %57, %61 : vector<4x8x8xf32>
    %63 = arith.truncf %62 : vector<4x8x8xf32> to vector<4x8x8xbf16>
    "tpu.trace_start"() <{level = 10 : i32, message = "hqk,hkd->hqd"}> : () -> ()
    %cst_24 = arith.constant dense<0.000000e+00> : vector<4x8x8xf32>
    %64 = tpu.matmul %63, %51, %cst_24 {dimension_numbers = #tpu.dot_dimension_numbers<[2], [1], [1], [2], [0, 0, 0, 1, 1, 2], [0], [0]>} : vector<4x8x8xbf16>, vector<4x8x8xbf16>, vector<4x8x8xf32> -> vector<4x8x8xf32>
    "tpu.trace_stop"() : () -> ()
    %65 = vector.extract_strided_slice %64 {offsets = [0, 0, 0], sizes = [1, 8, 8], strides = [1, 1, 1]} : vector<4x8x8xf32> to vector<1x8x8xf32>
    %66 = vector.shape_cast %65 : vector<1x8x8xf32> to vector<8x8xf32>
    %67 = vector.extract_strided_slice %64 {offsets = [1, 0, 0], sizes = [1, 8, 8], strides = [1, 1, 1]} : vector<4x8x8xf32> to vector<1x8x8xf32>
    %68 = vector.shape_cast %67 : vector<1x8x8xf32> to vector<8x8xf32>
    %69 = vector.extract_strided_slice %64 {offsets = [2, 0, 0], sizes = [1, 8, 8], strides = [1, 1, 1]} : vector<4x8x8xf32> to vector<1x8x8xf32>
    %70 = vector.shape_cast %69 : vector<1x8x8xf32> to vector<8x8xf32>
    %71 = vector.extract_strided_slice %64 {offsets = [3, 0, 0], sizes = [1, 8, 8], strides = [1, 1, 1]} : vector<4x8x8xf32> to vector<1x8x8xf32>
    %72 = vector.shape_cast %71 : vector<1x8x8xf32> to vector<8x8xf32>
    %73 = tpu.concatenate %66, %68, %70, %72 in 1 : vector<8x8xf32>, vector<8x8xf32>, vector<8x8xf32>, vector<8x8xf32> -> vector<8x32xf32>
    %cst_25 = arith.constant dense<0.000000e+00> : vector<8xf32>
    %74 = vector.multi_reduction <add>, %73, %cst_25 [1] : vector<8x32xf32> to vector<8xf32>
    %75 = vector.shape_cast %74 : vector<8xf32> to vector<8x1xf32>
    %cst_26 = arith.constant 3.200000e+01 : f32
    %76 = vector.broadcast %cst_26 : f32 to vector<8x1xf32>
    %77 = arith.divf %75, %76 : vector<8x1xf32>
    %78 = vector.broadcast %77 : vector<8x1xf32> to vector<8x32xf32>
    %79 = arith.subf %73, %78 : vector<8x32xf32>
    %80 = arith.mulf %79, %79 : vector<8x32xf32>
    %cst_27 = arith.constant dense<0.000000e+00> : vector<8xf32>
    %81 = vector.multi_reduction <add>, %80, %cst_27 [1] : vector<8x32xf32> to vector<8xf32>
    %82 = vector.shape_cast %81 : vector<8xf32> to vector<8x1xf32>
    %cst_28 = arith.constant 3.200000e+01 : f32
    %83 = vector.broadcast %cst_28 : f32 to vector<8x1xf32>
    %84 = arith.divf %82, %83 : vector<8x1xf32>
    %85 = vector.broadcast %77 : vector<8x1xf32> to vector<8x32xf32>
    %86 = arith.subf %73, %85 : vector<8x32xf32>
    %cst_29 = arith.constant 9.99999974E-6 : f32
    %87 = vector.broadcast %cst_29 : f32 to vector<8x1xf32>
    %88 = arith.addf %84, %87 : vector<8x1xf32>
    %89 = math.rsqrt %88 : vector<8x1xf32>
    %90 = vector.broadcast %89 : vector<8x1xf32> to vector<8x32xf32>
    %91 = arith.mulf %86, %90 : vector<8x32xf32>
    %92 = arith.truncf %91 : vector<8x32xf32> to vector<8x32xbf16>
    %c0_30 = arith.constant 0 : index
    %c0_31 = arith.constant 0 : index
    %93 = vector.load %arg7[%c0_30, %c0_31] : memref<32x32xbf16, #tpu.memory_space<vmem>>, vector<32x32xbf16>
    %cst_32 = arith.constant dense<0.000000e+00> : vector<8x32xf32>
    %94 = tpu.matmul %92, %93, %cst_32 {dimension_numbers = #tpu.dot_dimension_numbers<[1], [0], [0], [1], [0, 0, 1, 1], [], []>} : vector<8x32xbf16>, vector<32x32xbf16>, vector<8x32xf32> -> vector<8x32xf32>
    %95 = vector.broadcast %3 : vector<1x32xf32> to vector<8x32xf32>
    %96 = arith.addf %94, %95 : vector<8x32xf32>
    %c0_33 = arith.constant 0 : index
    %c0_34 = arith.constant 0 : index
    %c0_35 = arith.constant 0 : index
    %97 = vector.load %arg9[%c0_33, %c0_34, %c0_35] : memref<1x8x32xf32, #tpu.memory_space<vmem>>, vector<1x8x32xf32>
    %98 = vector.shape_cast %97 : vector<1x8x32xf32> to vector<8x32xf32>
    %99 = vector.shape_cast %96 : vector<8x32xf32> to vector<1x8x32xf32>
    tpu.vector_store %arg9[%c0_33, %c0_34, %c0_35], %99 {strides = array<i32>} : memref<1x8x32xf32, #tpu.memory_space<vmem>>, vector<1x8x32xf32>,
    return
  }
  func.func @transform_0(%arg0: i32) -> (i32, i32, i32) {
    %c0_i32 = arith.constant 0 : i32
    %c0_i32_0 = arith.constant 0 : i32
    %c0_i32_1 = arith.constant 0 : i32
    return %arg0, %c0_i32, %c0_i32_0 : i32, i32, i32
  }
  func.func @transform_1(%arg0: i32) -> (i32, i32, i32) {
    %c0_i32 = arith.constant 0 : i32
    %c0_i32_0 = arith.constant 0 : i32
    %c0_i32_1 = arith.constant 0 : i32
    return %arg0, %c0_i32, %c0_i32_0 : i32, i32, i32
  }
  func.func @transform_2(%arg0: i32) -> (i32, i32, i32) {
    %c0_i32 = arith.constant 0 : i32
    %c0_i32_0 = arith.constant 0 : i32
    %c0_i32_1 = arith.constant 0 : i32
    return %arg0, %c0_i32, %c0_i32_0 : i32, i32, i32
  }
  func.func @transform_3(%arg0: i32) -> (i32, i32) {
    %c0_i32 = arith.constant 0 : i32
    %c0_i32_0 = arith.constant 0 : i32
    %c0_i32_1 = arith.constant 0 : i32
    return %c0_i32, %c0_i32_0 : i32, i32
  }
  func.func @transform_4(%arg0: i32) -> (i32, i32) {
    %c0_i32 = arith.constant 0 : i32
    %c0_i32_0 = arith.constant 0 : i32
    %c0_i32_1 = arith.constant 0 : i32
    return %c0_i32, %c0_i32_0 : i32, i32
  }
  func.func @transform_5(%arg0: i32) -> (i32, i32) {
    %c0_i32 = arith.constant 0 : i32
    %c0_i32_0 = arith.constant 0 : i32
    %c0_i32_1 = arith.constant 0 : i32
    return %c0_i32, %c0_i32_0 : i32, i32
  }
  func.func @transform_6(%arg0: i32) -> (i32, i32) {
    %c0_i32 = arith.constant 0 : i32
    %c0_i32_0 = arith.constant 0 : i32
    %c0_i32_1 = arith.constant 0 : i32
    return %c0_i32, %c0_i32_0 : i32, i32
  }
  func.func @transform_7(%arg0: i32) -> (i32, i32) {
    %c0_i32 = arith.constant 0 : i32
    %c0_i32_0 = arith.constant 0 : i32
    %c0_i32_1 = arith.constant 0 : i32
    return %c0_i32, %c0_i32_0 : i32, i32
  }
  func.func @transform_8(%arg0: i32) -> (i32, i32, i32) {
    %c0_i32 = arith.constant 0 : i32
    %c0_i32_0 = arith.constant 0 : i32
    %c0_i32_1 = arith.constant 0 : i32
    return %arg0, %c0_i32, %c0_i32_0 : i32, i32, i32
  }
}

</mosaic_0001>

<bundles_post_ra>
// kernel: tpu_custom_call.1
= control target key start
LH: loop header
LB: loop body
LE: loop exit
PB: predicated region body
PF: predicated region fallthrough
CT: control target
= control target key end

     0   :  { %13 = vsyncpa [#allocation3], 0  ;;  %s1337_s0 = inlined_call_operand.vmem [shape: bf16[2,8,32], index: 0, kind: input, shape index: {}]   ;;  %s1338_s1 = inlined_call_operand.vmem [shape: bf16[2,8,64], index: 1, kind: input, shape index: {}]   ;;  %s1339_s2 = inlined_call_operand.vmem [shape: bf16[2,8,64], index: 2, kind: input, shape index: {}]   ;;  %s1340_s3 = inlined_call_operand.vmem [shape: bf16[32,32], index: 3, kind: input, shape index: {}]   ;;  %s1341_s4 = inlined_call_operand.vmem [shape: bf16[64,32], index: 4, kind: input, shape index: {}]   ;;  %s1342_s5 = inlined_call_operand.vmem [shape: bf16[64,32], index: 5, kind: input, shape index: {}]   ;;  %s1343_s6 = inlined_call_operand.vmem [shape: bf16[32,32], index: 6, kind: input, shape index: {}]   ;;  %s1344_s7 = inlined_call_operand.vmem [shape: f32[4,32], index: 7, kind: input, shape index: {}]   ;;  %s1345_s8 = inlined_call_operand.hbm [shape: f32[2,8,32], index: 8, kind: output, shape index: {}]  }
   0x1   :  { %15 = vsyncpa [#allocation3 + $0x1], 0  ;;  %s1152_s27 = smov 0   ;;  %s1154_s28 = smov 0  }
   0x2   :  { %s1156_s29 = smov 0   ;;  %s1158_s30 = smov 0  }
   0x3 LB: > { %s1173_s9 = sadd.s32 4294967295, %s1098_s30   ;;  %s882_s10 = sadd.s32 4294967294, %s1098_s30   ;;  %s1098_s30 = sphi %s1158_s30, %s1351_s30   ;;  %s1094_s29 = sphi %s1156_s29, %s1350_s29   ;;  %s1090_s28 = sphi %s1154_s28, %s1349_s28   ;;  %s1086_s27 = sphi %s1152_s27, %s1348_s27  }
   0x4   : > { %s1177_s11 = sadd.s32 1, %s1098_s30   ;;  %s211_s12 = sadd.s32 1, %s1094_s29 }
   0x5   : > { %s208_s13 = ssub.s32 %s1098_s30, %s1177_s11  ;;  %p221_p0 = scmp.ne.s32.totalorder %s1094_s29, %s1090_s28 }
   0x6   : > { %p209_p1 = scmp.eq.s32.totalorder %s208_s13, 0  ;;  %p222_p2 = scmp.eq.s32.totalorder %s1173_s9, 1 }
   0x7   : > { %p227_p3 = scmp.ne.s32.totalorder %s1090_s28, %s1086_s27  ;;  %p228_p4 = scmp.eq.s32.totalorder %s882_s10, 1 }
   0x8   : > { %s1188_s14 = scalar_select %p209_p1, %s1094_s29, %s211_s12  }
   0x9   : > { %p1190_p5 = por %p222_p2, %p221_p0  ;;  %p1194_p6 = por %p228_p4, %p227_p3 }
   0xa   : > { %p885_p7 = scmp.ge.s32.totalorder %s1098_s30, 1  ;;  %p282_p8 = scmp.lt.s32.totalorder %s1098_s30, 3 }
   0xc   : > { %p283_p9 = pnand %p885_p7, %p282_p8 }
   0xd   : > { %p323_p10 = scmp.lt.s32.totalorder (!%p283_p9), %s1173_s9, 1  ;;  %s1101_s17 = smov (!%p283_p9), 112  }
   0xe   : > { %286 = sbr.rel (%p283_p9) target bundleno = 1343 (0x53f), region = 52  ;;  %s1102_s18 = smov (!%p283_p9), 104  }
   0xf   : > { %s320_s10 = sand.u32 (!%p283_p9), 1, %s1090_s28   ;;  %s951_s12 = sshll.u32 (!%p283_p9), %s1173_s9, 3 }
  0x10   : > { %s886_s19 = sshll.u32 (!%p283_p9), %s320_s10, 3  ;;  %s794_s21 = scalar_lea.hbm (!%p283_p9), %s1345_s8, %s951_s12 }
  0x13   : > { %v959_v0 = vld [vmem:[%s1341_s4 + $0x18] sm:$0xff]  ;;  %v955_v1 = vld [vmem:[%s1340_s3 + $0x8] sm:$0xff]  ;;  %v958_v2 = vld [vmem:[%s1341_s4 + $0x10] sm:$0xff]  ;;  %s324_s23 = scalar_select %p323_p10, %s1173_s9, 1  ;;  %vm358_vm0 = vcmask 261120   ;;  %vm409_vm1 = vcmask 523264  }
  0x14   : > { %417 = vmatpush.bf16.msra.mxu1 %v959_v0  ;;  %v954_v3 = vld [vmem:[%s1340_s3] sm:$0xff]  ;;  %368 = vmatpush.bf16.msra.mxu0 %v955_v1  ;;  %v957_v4 = vld [vmem:[%s1341_s4 + $0x8] sm:$0xff]  ;;  %vm500_vm2 = vcmask 64512   ;;  %v963_v23 = vld [vmem:[%s1342_s5 + $0x18] sm:$0xff]  ;;  %vm628_vm3 = vcmask 1043456   ;;  %vm715_vm4 = vcmask 130048  }
  0x15   : > { %s1214_s26 = sshll.u32 %s324_s23, 2  ;;  %v956_v6 = vld [vmem:[%s1341_s4] sm:$0xff]  ;;  %467 = vmatpush.bf16.msra.mxu2 %v963_v23  ;;  %v962_v24 = vld [vmem:[%s1342_s5 + $0x10] sm:$0xff]  ;;  %v961_v32 = vld [vmem:[%s1342_s5 + $0x8] sm:$0xff]  ;;  %vm717_vm5 = vcmask 195584   ;;  %s784_s9 = scalar_lea.sflag [#allocation3], %s320_s10 }
  0x16   : > { %s326_s13 = scalar_lea.vmem %s1337_s0, %s1214_s26  ;;  %s330_s23 = scalar_lea.vmem %s1338_s1, %s1214_s26  ;;  %v1013_v8 = vld [vmem:[%s1344_s7] ss:$0 sm:$0xff]  ;;  %v1012_v12 = vld [vmem:[%s1344_s7 + $0x1] ss:$0 sm:$0xff]  ;;  %v1014_v46 = vld [vmem:[%s1344_s7 + $0x2] ss:$0 sm:$0xff] }
  0x17   : > { %v340_v5 = vld [vmem:[%s326_s13] sm:$0xf]  ;;  %s1100_s13 = smov 120   ;;  %s334_s20 = scalar_lea.vmem %s1339_s2, %s1214_s26 }
  0x18   : > { %418 = vmatpush.bf16.msra.mxu1 %v958_v2  ;;  %369 = vmatpush.bf16.msra.mxu0 %v954_v3  ;;  %v375_v7 = vld [vmem:[%s330_s23] sm:$0xf]  ;;  %s798_s23 = sshll.u32 %s794_s21, 4  ;;  %s799_s23 = int_to_ptr.hbm [resolvable:$true] %s798_s23 }
  0x19   : > { %468 = vmatpush.bf16.msra.mxu2 %v962_v24  ;;  %v960_v33 = vld [vmem:[%s1342_s5] sm:$0xff]  ;;  %s1050_s24 = sshra.s32 %s799_s23, 4  ;;  %s1051_s24 = int_to_ptr.hbm [resolvable:$true] %s1050_s24 }
  0x1a   : > { %v426_v34 = vld [vmem:[%s334_s20] sm:$0xf]  ;;  %s1052_s25 = scalar_lea.hbm %s1051_s24, 8  ;;  %p1057_p0 = scmp.lt.s32.totalorder %s1051_s24, %s1345_s8 }
  0x1b   : > { %898 = vmatmul.msk.bf16.vlgmr.msra.gmra.mxu0 %vm358_vm0, %v340_v5  ;;  %p1053_p11 = scmp.ne.s32.totalorder %s1051_s24, %s1052_s25 }
  0x1c   : > { %419 = vmatpush.bf16.msra.mxu1 %v957_v4 }
  0x1d   : > { %469 = vmatpush.bf16.msra.mxu2 %v961_v32  ;;  %p1054_p12 = pnand %p1053_p11, %p1190_p5 }
  0x1f   : > { %p1055_p13 = pneg %p1054_p12 }
  0x20   : > { %420 = vmatpush.bf16.msra.mxu1 %v956_v6 }
  0x21   : > { %470 = vmatpush.bf16.msra.mxu2 %v960_v33 }
  0x23   : > { %915 = vmatmul.msk.bf16.vlgmr.msra.gmra.mxu1 %vm409_vm1, %v375_v7 }
  0x24   : > { %932 = vmatmul.msk.bf16.vlgmr.msra.gmra.mxu2 %vm409_vm1, %v426_v34 }
  0x98   : > { %v371_v9 = vpop.f32.mrf.mxu0 }
  0x99   : > { %v372_v10 = vadd.f32 %v1013_v8, %v371_v9 }
  0x9b   : > { %v476_v11 = vpack.c.bf16 %v372_v10, %v372_v10 }
  0x9d   : > { %480 = vrot.lane.b32.xlu2 %v476_v11, %s1100_s13 }
  0xa0   : > { %v422_v13 = vpop.f32.mrf.mxu1  ;;  %v373_v15 = vpop.f32.mrf.mxu0 }
  0xa1   : > { %v423_v14 = vadd.f32 %v1012_v12, %v422_v13 }
  0xa3   : > { %v477_v16 = vpack.c.bf16 %v423_v14, %v423_v14 }
  0xa5   : > { %487 = vrot.lane.b32.xlu1 %v477_v16, %s1100_s13  ;;  %489 = vrot.lane.b32.xlu0 %v477_v16, %s1101_s17  ;;  %v505_v17 = vsel %vm500_vm2, %v477_v16, 0 }
  0xa6   : > { %514 = vmatpush.bf16.xpose.msra.mxu3 %v505_v17  ;;  %484 = vrot.lane.b32.xlu2 %v476_v11, %s1102_s18 }
  0xa7   : > { %v472_v45 = vpop.f32.mrf.mxu2 }
  0xa8   : > { %v424_v18 = vpop.f32.mrf.mxu1  ;;  %v473_v47 = vadd.f32 %v1014_v46, %v472_v45 }
  0xaa   : > { %v478_v51 = vpack.c.bf16 %v473_v47, %v473_v47 }
  0xac   : > { %v630_v54 = vsel %vm628_vm3, %v478_v51, 0 }
  0xad   : > { %491 = vrot.lane.b32.xlu1 %v477_v16, %s1102_s18  ;;  %482 = vrot.lane.b32.xlu0 %v476_v11, %s1101_s17 }
  0xae   : > { %933 = vmatmul.msk.bf16.vlgmr.msra.gmra.mxu3 %vm500_vm2, %v476_v11  ;;  %639 = vmatpush.bf16.msrb.mxu2 %v630_v54 }
  0xaf   : > { %v474_v50 = vpop.f32.mrf.mxu2 }
  0xf7   : > { %v481_v25 = vpop.permute.xlu2 %480 }
 0x100   : > { %v485_v29 = vpop.permute.xlu2 %484 }
 0x117   : > { %v488_v19 = vpop.permute.xlu1 %487  ;;  %v490_v20 = vpop.permute.xlu0 %489 }
 0x118   : > { %v524_v21 = vsel %vm500_vm2, %v488_v19, 0  ;;  %v543_v22 = vsel %vm500_vm2, %v490_v20, 0 }
 0x119   : > { %533 = vmatpush.bf16.xpose.msrb.mxu0 %v524_v21  ;;  %552 = vmatpush.bf16.xpose.msrb.mxu3 %v543_v22 }
 0x11f   : > { %v492_v26 = vpop.permute.xlu1 %491  ;;  %v483_v27 = vpop.permute.xlu0 %482 }
 0x120   : > { %934 = vmatmul.msk.bf16.vlgmr.msrb.gmra.mxu0 %vm500_vm2, %v481_v25  ;;  %935 = vmatmul.msk.bf16.vlgmr.msrb.gmra.mxu3 %vm500_vm2, %v483_v27  ;;  %v562_v28 = vsel %vm500_vm2, %v492_v26, 0 }
 0x121   : > { %571 = vmatpush.bf16.xpose.msrb.mxu1 %v562_v28 }
 0x128   : > { %936 = vmatmul.msk.bf16.vlgmr.msrb.gmra.mxu1 %vm500_vm2, %v485_v29 }
 0x131   : > { %v516_v30 = vpop.f32.mrf.mxu3 }
 0x132   : > { %v577_v44 = vsel %vm500_vm2, %v516_v30, -inf }
 0x139   : > { %v518_v31 = vpop.f32.mrf.mxu3 }
 0x19d   : > { %v535_v35 = vpop.f32.mrf.mxu0 }
 0x19e   : > { %v580_v36 = vsel %vm500_vm2, %v535_v35, -inf }
 0x19f   : > { %581 = vmax.xlane.f32.xlu1 %v580_v36 }
 0x1a3   : > { %v554_v37 = vpop.f32.mrf.mxu3 }
 0x1a4   : > { %v583_v38 = vsel %vm500_vm2, %v554_v37, -inf }
 0x1a5   : > { %v537_v39 = vpop.f32.mrf.mxu0  ;;  %v573_v40 = vpop.f32.mrf.mxu1  ;;  %584 = vmax.xlane.f32.xlu0 %v583_v38 }
 0x1a6   : > { %v586_v41 = vsel %vm500_vm2, %v573_v40, -inf }
 0x1a7   : > { %587 = vmax.xlane.f32.xlu2 %v586_v41 }
 0x1ab   : > { %v556_v42 = vpop.f32.mrf.mxu3 }
 0x1ad   : > { %v575_v43 = vpop.f32.mrf.mxu1 }
 0x1af   : > { %578 = vmax.xlane.f32.xlu2 %v577_v44  ;;  %v1106_v44 = vmov 32.0  }
 0x212   : > { %v582_v48 = vpop.xlane.xlu1 %581 }
 0x213   : > { %v590_v49 = vsub.f32 %v535_v35, %v582_v48 }
 0x215   : > { %v595_v52 = vmul.f32 1.442695, %v590_v49 }
 0x217   : > { %1016 = vpow2.f32 %v595_v52 }
 0x218   : > { %v585_v53 = vpop.xlane.xlu0 %584 }
 0x219   : > { %v591_v55 = vsub.f32 %v554_v37, %v585_v53 }
 0x21a   : > { %v588_v56 = vpop.xlane.xlu2 %587 }
 0x21b   : > { %v597_v57 = vmul.f32 1.442695, %v591_v55  ;;  %v592_v58 = vsub.f32 %v573_v40, %v588_v56  ;;  %v965_v56 = vld [vmem:[%s1343_s6 + $0x8] sm:$0xff] }
 0x21c   : > { %775 = vmatpush.bf16.msra.mxu2 %v965_v56 }
 0x21d   : > { %v1017_v59 = vpop.eup %1016  ;;  %1018 = vpow2.f32 %v597_v57  ;;  %v599_v60 = vmul.f32 1.442695, %v592_v58  ;;  %v964_v57 = vld [vmem:[%s1343_s6] sm:$0xff] }
 0x21e   : > { %v604_v61 = vsel %vm500_vm2, %v1017_v59, 0.0 }
 0x21f   : > { %1020 = vpow2.f32 %v599_v60  ;;  %605 = vadd.xlane.f32.xlu1 %v604_v61 }
 0x220   : > { %776 = vmatpush.bf16.msra.mxu2 %v964_v57 }
 0x222   : > { %v579_v2 = vpop.xlane.xlu2 %578 }
 0x223   : > { %v1019_v62 = vpop.eup %1018  ;;  %v589_v3 = vsub.f32 %v516_v30, %v579_v2 }
 0x224   : > { %v607_v63 = vsel %vm500_vm2, %v1019_v62, 0.0 }
 0x225   : > { %v1021_v0 = vpop.eup %1020  ;;  %608 = vadd.xlane.f32.xlu0 %v607_v63  ;;  %v593_v4 = vmul.f32 1.442695, %v589_v3 }
 0x226   : > { %v610_v1 = vsel %vm500_vm2, %v1021_v0, 0.0 }
 0x227   : > { %611 = vadd.xlane.f32.xlu2 %v610_v1  ;;  %1022 = vpow2.f32 %v593_v4 }
 0x22d   : > { %v1023_v5 = vpop.eup %1022 }
 0x22e   : > { %v601_v6 = vsel %vm500_vm2, %v1023_v5, 0.0 }
 0x238   : > { %494 = vrot.lane.b32.xlu1 %v478_v51, %s1100_s13  ;;  %s1103_s13 = smov 8  }
 0x239   : > { %496 = vrot.lane.b32.xlu0 %v478_v51, %s1101_s17  ;;  %s1104_s17 = smov 16  }
 0x23f   : > { %498 = vrot.lane.b32.xlu2 %v478_v51, %s1102_s18  ;;  %s1105_s18 = smov 24  }
 0x263   : > { %602 = vadd.xlane.f32.xlu0 %v601_v6  ;;  %v1015_v6 = vld [vmem:[%s1344_s7 + $0x3] ss:$0 sm:$0xff] }
 0x292   : > { %v606_v8 = vpop.xlane.xlu1 %605 }
 0x298   : > { %v609_v9 = vpop.xlane.xlu0 %608 }
 0x29a   : > { %v612_v7 = vpop.xlane.xlu2 %611 }
 0x29b   : > { %1024 = vrcp.f32 %v612_v7 }
 0x29c   : > { %1026 = vrcp.f32 %v606_v8 }
 0x29d   : > { %1028 = vrcp.f32 %v609_v9 }
 0x2a1   : > { %v1025_v10 = vpop.eup %1024 }
 0x2a2   : > { %v620_v11 = vmul.f32 %v1025_v10, %v1021_v0  ;;  %v499_v12 = vpop.permute.xlu2 %498  ;;  %v1027_v15 = vpop.eup %1026 }
 0x2a3   : > { %v687_v13 = vsel %vm628_vm3, %v499_v12, 0  ;;  %v1029_v16 = vpop.eup %1028  ;;  %v618_v17 = vmul.f32 %v1027_v15, %v1017_v59 }
 0x2a4   : > { %v624_v14 = vpack.c.bf16 %v620_v11, %v620_v11  ;;  %696 = vmatpush.bf16.msra.mxu1 %v687_v13  ;;  %v619_v18 = vmul.f32 %v1029_v16, %v1019_v62 }
 0x2a5   : > { %v622_v23 = vpack.c.bf16 %v618_v17, %v618_v17 }
 0x2a6   : > { %v623_v24 = vpack.c.bf16 %v619_v18, %v619_v18 }
 0x2a7   : > { %940 = vmatmul.msk.bf16.vlgmr.msra.gmra.mxu1 %vm500_vm2, %v624_v14 }
 0x2aa   : > { %v495_v19 = vpop.permute.xlu1 %494 }
 0x2ab   : > { %v649_v20 = vsel %vm628_vm3, %v495_v19, 0  ;;  %v497_v21 = vpop.permute.xlu0 %496 }
 0x2ac   : > { %v668_v22 = vsel %vm628_vm3, %v497_v21, 0  ;;  %658 = vmatpush.bf16.msra.mxu0 %v649_v20 }
 0x2ad   : > { %677 = vmatpush.bf16.msra.mxu3 %v668_v22 }
 0x2af   : > { %938 = vmatmul.msk.bf16.vlgmr.msra.gmra.mxu0 %vm500_vm2, %v622_v23 }
 0x2b0   : > { %939 = vmatmul.msk.bf16.vlgmr.msra.gmra.mxu3 %vm500_vm2, %v623_v24 }
 0x2d6   : > { %v603_v25 = vpop.xlane.xlu0 %602 }
 0x2d7   : > { %1030 = vrcp.f32 %v603_v25 }
 0x2d8   : > { %1032 = vrcp.f32 %v1106_v44 }
 0x2dd   : > { %v1031_v26 = vpop.eup %1030 }
 0x2de   : > { %v617_v27 = vmul.f32 %v1031_v26, %v1023_v5  ;;  %v1033_v45 = vpop.eup %1032 }
 0x2df   : > { %v723_v46 = vmul.f32 32.0, %v1033_v45  ;;  %vm727_vm6 = vweird.f32 %v1033_v45 }
 0x2e0   : > { %v621_v28 = vpack.c.bf16 %v617_v27, %v617_v27 }
 0x2e1   : > { %v724_v47 = vsub.f32 1.0, %v723_v46 }
 0x2e2   : > { %937 = vmatmul.msk.bf16.vlgmr.msrb.gmra.mxu2 %vm500_vm2, %v621_v28 }
 0x2e3   : > { %v725_v48 = vmul.f32 %v1033_v45, %v724_v47 }
 0x2e5   : > { %v726_v49 = vadd.f32 %v1033_v45, %v725_v48 }
 0x2e7   : > { %v728_v50 = vsel %vm727_vm6, %v1033_v45, %v726_v49 }
 0x324   : > { %v698_v29 = vpop.f32.mrf.mxu1 }
 0x32c   : > { %v660_v30 = vpop.f32.mrf.mxu0  ;;  %v700_v31 = vpop.f32.mrf.mxu1 }
 0x32d   : > { %703 = vrot.lane.b32.xlu1 %v660_v30, %s1103_s13 }
 0x333   : > { %v679_v32 = vpop.f32.mrf.mxu3 }
 0x334   : > { %v662_v33 = vpop.f32.mrf.mxu0  ;;  %707 = vrot.lane.b32.xlu2 %v679_v32, %s1104_s17 }
 0x335   : > { %711 = vrot.lane.b32.xlu1 %v698_v29, %s1105_s18  ;;  %s322_s18 = scalar_lea.vmem [#allocation2], %s886_s19  ;;  %s1056_s19 = scalar_lea.hbm %s1345_s8, 16 }
 0x336   : > { %s796_s22 = sshll.u32 %s322_s18, 4  ;;  %p1058_p1 = scmp.lt.s32.totalorder %s1056_s19, %s1052_s25  ;;  %s797_s22 = int_to_ptr.vmem [resolvable:$true] %s796_s22 }
 0x338   : > { %p1059_p2 = por %p1058_p1, %p1057_p0 }
 0x33a   : > { %p1060_p3 = pnand %p1059_p2, %p1055_p13 }
 0x33b   : > { %v681_v34 = vpop.f32.mrf.mxu3 }
 0x365   : > { %v641_v35 = vpop.f32.mrf.mxu2 }
 0x36d   : > { %v643_v36 = vpop.f32.mrf.mxu2 }
 0x38e   : > { %v708_v39 = vpop.permute.xlu2 %707 }
 0x39f   : > { %v704_v37 = vpop.permute.xlu1 %703 }
 0x3a0   : > { %v714_v38 = vsel %vm500_vm2, %v641_v35, %v704_v37 }
 0x3a1   : > { %v716_v41 = vsel %vm715_vm4, %v714_v38, %v708_v39 }
 0x3a7   : > { %v712_v40 = vpop.permute.xlu1 %711 }
 0x3a8   : > { %v718_v42 = vsel %vm717_vm5, %v716_v41, %v712_v40 }
 0x3a9   : > { %v719_v43 = vsel %vm358_vm0, %v718_v42, 0.0 }
 0x3aa   : > { %720 = vadd.xlane.f32.xlu2 %v719_v43 }
 0x41d   : > { %v721_v51 = vpop.xlane.xlu2 %720 }
 0x41e   : > { %v729_v52 = vmul.f32 %v728_v50, %v721_v51 }
 0x420   : > { %v730_v53 = vsub.f32 %v718_v42, %v729_v52 }
 0x422   : > { %v731_v54 = vmul.f32 %v730_v53, %v730_v53 }
 0x424   : > { %v732_v55 = vsel %vm358_vm0, %v731_v54, 0.0 }
 0x425   : > { %733 = vadd.xlane.f32.xlu1 %v732_v55 }
 0x498   : > { %v734_v58 = vpop.xlane.xlu1 %733 }
 0x499   : > { %v735_v59 = vmul.f32 %v734_v58, %v728_v50 }
 0x49b   : > { %v736_v60 = vadd.f32 1e-05, %v735_v59 }
 0x49d   : > { %1034 = vrsqrt.f32 %v736_v60  ;;  %vm743_vm8 = vweird.f32 %v736_v60 }
 0x4a3   : > { %v1035_v61 = vpop.eup %1034 }
 0x4a4   : > { %v738_v62 = vmul.f32 %v1035_v61, %v736_v60  ;;  %vm744_vm7 = vweird.f32 %v1035_v61 }
 0x4a5   : > { %vm745_vm9 = vmor %vm743_vm8, %vm744_vm7 }
 0x4a6   : > { %v739_v63 = vmul.f32 %v1035_v61, %v738_v62 }
 0x4a8   : > { %v740_v0 = vmul.f32 0.5, %v739_v63 }
 0x4aa   : > { %v741_v1 = vsub.f32 1.5, %v740_v0 }
 0x4ac   : > { %v742_v2 = vmul.f32 %v1035_v61, %v741_v1 }
 0x4ae   : > { %v746_v3 = vsel %vm745_vm9, %v1035_v61, %v742_v2 }
 0x4af   : > { %v747_v4 = vmul.f32 %v746_v3, %v730_v53 }
 0x4b1   : > { %v748_v5 = vpack.c.bf16 %v747_v4, %v747_v4 }
 0x4b3   : > { %949 = vmatmul.msk.bf16.vlgmr.msra.gmra.mxu2 %vm358_vm0, %v748_v5 }
 0x536   : > { %v778_v7 = vpop.f32.mrf.mxu2 }
 0x537   : > { %v779_v8 = vadd.f32 %v1015_v6, %v778_v7 }
 0x539   : > { %782 = vst.msk [vmem:[%s322_s18] sm:$0xff] %vm358_vm0, %v779_v8 }
 0x53a   : > { %1063 = shalt.err (!%p1060_p3)
}
 0x53b   : > { %966 = dma.vmem_to_hbm [thread:$0]  (%p1190_p5), %s797_s22, 128, %s799_s23, %s784_s9  }
 0x53e   : > { %v780_v9 = vpop.f32.mrf.mxu2 }
 0x53f PF: > { %p972_p4 = scmp.ge.s32.totalorder %s1098_s30, 2  ;;  %s810_s10 = sand.u32 1, %s1086_s27  }
 0x540   : > { %s811_s13 = scalar_lea.sflag [#allocation3], %s810_s10 }
 0x541   : > { %p969_p7 = pnand %p972_p4, %p1194_p6 }
 0x543   : > { %p970_p8 = pneg %p969_p7 }
 0x545   : > { %1081 = dma.done.wait (%p970_p8), %s811_s13, 128  }
 0x546   : > { %1083 = vsyncadd (%p970_p8), %s811_s13, 4294967168  ;;  %p18_p9 = scmp.ge.s32.totalorder %s1177_s11, 4   ;;  %s1348_s27 = smov %s1090_s28 }
 0x547   : > { %s1349_s28 = smov %s1094_s29  ;;  %s1350_s29 = smov %s1188_s14 }
 0x548   : > { %s1351_s30 = smov %s1177_s11  ;;  %20 = sbr.rel (!%p18_p9) target bundleno = 3 (0x3), region = 93 }
 0x54d   :  { %817 = vsyncpa [#allocation3], 1 }
 0x54e   :  { %819 = vsyncpa [#allocation3 + $0x1], 1 }

</bundles_post_ra>
